<compile_context>
chip_gen: v7x
topology: tpu7x:2x2x1
jax: 0.10.0
libtpu: 0.0.40
codegen_flags: <defaults>
</compile_context>

<pallas_src>
import functools

import jax
import jax.numpy as jnp
from jax.experimental import pallas as pl
from jax.experimental.pallas import tpu as pltpu

# Scoped-VMEM cap: above default (16/32 MiB) so TM=512 at real ResNet shapes
# fits on v5e/v6e, and <= v7x's 64 MiB physical per-TC VMEM.
_VMEM_LIMIT_BYTES = 64 * 1024 * 1024


# ----------------------------- helpers --------------------------------------

def _round_up(x, m):
    return (x + m - 1) // m * m


def _pad2d(a, rows, cols):
    r, c = a.shape
    return jnp.pad(a, ((0, rows - r), (0, cols - c)))


def _choose_tiling(m, tm_target=512):
    """Matmul row-tile (multiple of 8) and padded M (multiple of the tile)."""
    m8 = _round_up(m, 8)
    if m8 <= tm_target:
        return m8, m8
    return tm_target, _round_up(m, tm_target)


def _elementwise_tile(m_pad, tm, target_rows=4096):
    """Larger row tile for the pure-streaming BN/ReLU pass; must divide M_pad."""
    nt = m_pad // tm
    k = max(1, min(nt, target_rows // tm))
    while nt % k:
        k -= 1
    return tm * k


# --------------------------- Pallas kernels ---------------------------------

def _matmul_stats_kernel(p_ref, w_ref, acc_ref, stats_ref):
    """One M-tile of the im2col conv: MXU matmul + per-tile BN partial stats."""
    acc = jnp.dot(p_ref[...], w_ref[...], preferred_element_type=jnp.float32)
    # Store the intermediate in bf16 (halves the HBM round-trip); stats stay
    # in f32 from the in-register accumulator.  Zero-padded rows contribute
    # nothing, so the wrapper divides by the true M.
    acc_ref[...] = acc.astype(acc_ref.dtype)
    stats_ref[0, 0:1, :] = jnp.sum(acc, axis=0, keepdims=True)
    stats_ref[0, 1:2, :] = jnp.sum(acc * acc, axis=0, keepdims=True)


def conv_matmul_stats(patches, w2d, *, tm):
    """patches [M_pad, K_pad] bf16 @ w2d [K_pad, C_pad] bf16 -> bf16 acc + f32 stats."""
    m_pad, k_pad = patches.shape
    c_pad = w2d.shape[1]
    nt = m_pad // tm
    flops = 2 * m_pad * k_pad * c_pad + 3 * m_pad * c_pad
    bytes_accessed = (m_pad * k_pad * 2 + k_pad * c_pad * 2
                      + m_pad * c_pad * 2 + nt * 2 * c_pad * 4)
    return pl.pallas_call(
        _matmul_stats_kernel,
        out_shape=(
            jax.ShapeDtypeStruct((m_pad, c_pad), jnp.bfloat16),
            jax.ShapeDtypeStruct((nt, 2, c_pad), jnp.float32),
        ),
        grid=(nt,),
        in_specs=[
            pl.BlockSpec((tm, k_pad), lambda i: (i, 0)),
            pl.BlockSpec((k_pad, c_pad), lambda i: (0, 0)),
        ],
        out_specs=(
            pl.BlockSpec((tm, c_pad), lambda i: (i, 0)),
            pl.BlockSpec((1, 2, c_pad), lambda i: (i, 0, 0)),
        ),
        compiler_params=pltpu.CompilerParams(
            dimension_semantics=("parallel",),
            vmem_limit_bytes=_VMEM_LIMIT_BYTES),
        cost_estimate=pl.CostEstimate(flops=flops, transcendentals=0,
                                      bytes_accessed=bytes_accessed),
    )(patches, w2d)


def _bn_act_kernel(*refs, has_residual, apply_relu):
    """y = acc*scale + shift (+ res*r_scale + r_shift) (+ ReLU), one M-tile."""
    if has_residual:
        a_ref, sa_ref, ba_ref, r_ref, sr_ref, br_ref, o_ref = refs
    else:
        a_ref, sa_ref, ba_ref, o_ref = refs
    y = a_ref[...].astype(jnp.float32) * sa_ref[...] + ba_ref[...]
    if has_residual:
        y = y + r_ref[...].astype(jnp.float32) * sr_ref[...] + br_ref[...]
    if apply_relu:
        y = jnp.maximum(y, 0.0)
    o_ref[...] = y.astype(o_ref.dtype)


def bn_act(acc, scale, shift, *, residual=None, r_scale=None, r_shift=None,
           apply_relu, tile_rows, out_dtype=jnp.float32):
    m_pad, c_pad = acc.shape
    nt = m_pad // tile_rows
    has_res = residual is not None
    kern = functools.partial(_bn_act_kernel, has_residual=has_res,
                             apply_relu=apply_relu)
    row_spec = pl.BlockSpec((tile_rows, c_pad), lambda i: (i, 0))
    vec_spec = pl.BlockSpec((1, c_pad), lambda i: (0, 0))
    in_specs = [row_spec, vec_spec, vec_spec]
    args = [acc, scale, shift]
    if has_res:
        in_specs += [row_spec, vec_spec, vec_spec]
        args += [residual, r_scale, r_shift]
    out_itemsize = jnp.dtype(out_dtype).itemsize
    bytes_accessed = (m_pad * c_pad * 2 + 2 * c_pad * 4
                      + (m_pad * c_pad * 2 + 2 * c_pad * 4 if has_res else 0)
                      + m_pad * c_pad * out_itemsize)
    flops = m_pad * c_pad * (6 if has_res else 3)
    return pl.pallas_call(
        kern,
        out_shape=jax.ShapeDtypeStruct((m_pad, c_pad), out_dtype),
        grid=(nt,),
        in_specs=in_specs,
        out_specs=row_spec,
        compiler_params=pltpu.CompilerParams(
            dimension_semantics=("parallel",),
            vmem_limit_bytes=_VMEM_LIMIT_BYTES),
        cost_estimate=pl.CostEstimate(flops=flops, transcendentals=0,
                                      bytes_accessed=bytes_accessed),
    )(*args)


# ------------------------------- JAX glue ------------------------------------

def im2col_padded(x_nhwc, ksize, stride, padding, k_pad, m_pad):
    """Conv patches built directly at padded shape [M_pad, K_pad] (kh,kw,cin order).

    The K zero-padding is fused into the same concatenate (no extra slab copy);
    row padding is only materialized when M is not a multiple of the tile.
    """
    N, H, W, C = x_nhwc.shape
    xp = jnp.pad(x_nhwc, ((0, 0), (padding, padding), (padding, padding), (0, 0)))
    Ho = (H + 2 * padding - ksize) // stride + 1
    Wo = (W + 2 * padding - ksize) // stride + 1
    cols = []
    for kh in range(ksize):
        for kw in range(ksize):
            cols.append(xp[:, kh:kh + stride * Ho:stride,
                           kw:kw + stride * Wo:stride, :])
    k = ksize * ksize * C
    if k_pad > k:
        cols.append(jnp.zeros((N, Ho, Wo, k_pad - k), x_nhwc.dtype))
    patches = jnp.concatenate(cols, axis=-1).reshape(N * Ho * Wo, k_pad)
    m = N * Ho * Wo
    if m_pad > m:
        patches = jnp.concatenate(
            [patches, jnp.zeros((m_pad - m, k_pad), patches.dtype)], axis=0)
    return patches.astype(jnp.bfloat16), Ho, Wo


def bn_scale_shift(stats, m_true, gamma_p, beta_p, eps=1e-5):
    """Reduce per-tile partial moments (nt, 2, C) -> per-channel (scale, shift)."""
    s = jnp.sum(stats, axis=0)                 # (2, C_pad): rows 0/1 = sum/sumsq
    mean = s[0:1] / m_true
    var = s[1:2] / m_true - mean * mean
    var = jnp.maximum(var, 0.0)                # guard E[x^2]-mean^2 cancellation
    inv = jax.lax.rsqrt(var + eps)
    scale = gamma_p * inv
    shift = beta_p - mean * scale
    return scale, shift


def _conv_bn_affine(x_bf16, w_hwio, gamma, beta, *, ksize, stride, padding,
                    m_pad, tm, c_pad, eps=1e-5):
    """Tiled im2col-conv (pass 1) + global BN affine. Returns (bf16 acc, sc, sh)."""
    cin, cout = w_hwio.shape[2], w_hwio.shape[3]
    k = ksize * ksize * cin
    k_pad = _round_up(k, 128)
    patches, Ho, Wo = im2col_padded(x_bf16, ksize, stride, padding, k_pad, m_pad)
    m_true = x_bf16.shape[0] * Ho * Wo
    w_p = _pad2d(w_hwio.reshape(k, cout).astype(jnp.bfloat16), k_pad, c_pad)
    acc, stats = conv_matmul_stats(patches, w_p, tm=tm)
    # NOTE: gamma/beta are zero-padded so scale/shift are exactly 0 in padded
    # lanes -> padded channels stay 0 until sliced off.  Do not pad with ones.
    g_p = _pad2d(gamma, 1, c_pad)
    b_p = _pad2d(beta, 1, c_pad)
    scale, shift = bn_scale_shift(stats, m_true, g_p, b_p, eps)
    return acc, scale, shift


def init_resblock_params(key, in_channels, out_channels, stride):
    """Deterministic synthetic init.  Conv weights stored as [Kh, Kw, Cin, Cout]
    (transpose of PyTorch's [Cout, Cin, Kh, Kw]); BN gamma/beta as [1, Cout]."""
    ks = jax.random.split(key, 8)
    p = {
        "w1": 0.1 * jax.random.normal(ks[0], (3, 3, in_channels, out_channels), jnp.float32),
        "g1": 1.0 + 0.05 * jax.random.normal(ks[1], (1, out_channels), jnp.float32),
        "b1": 0.05 * jax.random.normal(ks[2], (1, out_channels), jnp.float32),
        "w2": 0.1 * jax.random.normal(ks[3], (3, 3, out_channels, out_channels), jnp.float32),
        "g2": 1.0 + 0.05 * jax.random.normal(ks[4], (1, out_channels), jnp.float32),
        "b2": 0.05 * jax.random.normal(ks[5], (1, out_channels), jnp.float32),
    }
    if stride != 1 or in_channels != out_channels:
        p["ws"] = 0.1 * jax.random.normal(ks[6], (1, 1, in_channels, out_channels), jnp.float32)
        p["gs"] = 1.0 + 0.05 * jax.random.normal(ks[7], (1, out_channels), jnp.float32)
        p["bs"] = jnp.zeros((1, out_channels), jnp.float32)
    return p


def resblock_forward(x_nchw, params, stride, *, tm_target=512, eps=1e-5):
    N, Cin, H, W = x_nchw.shape
    Cout = params["w1"].shape[-1]
    Cp = _round_up(Cout, 128)

    x = jnp.transpose(x_nchw, (0, 2, 3, 1))          # NCHW -> NHWC
    x_bf = x.astype(jnp.bfloat16)

    Ho = (H + 2 - 3) // stride + 1
    Wo = (W + 2 - 3) // stride + 1
    M = N * Ho * Wo
    tm, M_pad = _choose_tiling(M, tm_target)
    te = _elementwise_tile(M_pad, tm)                # bigger tile for streaming pass

    # residual_function: conv3x3(stride, pad=1) -> BN -> ReLU
    acc1, sc1, sh1 = _conv_bn_affine(x_bf, params["w1"], params["g1"], params["b1"],
                                     ksize=3, stride=stride, padding=1,
                                     m_pad=M_pad, tm=tm, c_pad=Cp, eps=eps)
    # Emit y1 directly in bf16: it only feeds the next bf16 matmul.
    y1 = bn_act(acc1, sc1, sh1, apply_relu=True, tile_rows=te,
                out_dtype=jnp.bfloat16)
    y1 = y1[:M, :Cout].reshape(N, Ho, Wo, Cout)

    # residual_function (cont): conv3x3(stride=1, pad=1) -> BN (ReLU fused below)
    acc2, sc2, sh2 = _conv_bn_affine(y1, params["w2"], params["g2"], params["b2"],
                                     ksize=3, stride=1, padding=1,
                                     m_pad=M_pad, tm=tm, c_pad=Cp, eps=eps)

    # shortcut: identity, or conv1x1(stride) -> BN (affine fused into epilogue)
    if "ws" in params:
        res, scr, shr = _conv_bn_affine(x_bf, params["ws"], params["gs"], params["bs"],
                                        ksize=1, stride=stride, padding=0,
                                        m_pad=M_pad, tm=tm, c_pad=Cp, eps=eps)
    else:
        res = jnp.pad(x_bf.reshape(N * H * W, Cin),
                      ((0, M_pad - M), (0, Cp - Cin)))          # bf16 residual
        scr = jnp.ones((1, Cp), jnp.float32)
        shr = jnp.zeros((1, Cp), jnp.float32)

    # fused epilogue: relu(bn2(conv2) + bn_s(shortcut))
    out = bn_act(acc2, sc2, sh2, residual=res, r_scale=scr, r_shift=shr,
                 apply_relu=True, tile_rows=te, out_dtype=jnp.float32)
    out = out[:M, :Cout].reshape(N, Ho, Wo, Cout)
    return jnp.transpose(out, (0, 3, 1, 2))          # NHWC -> NCHW


# --------------------------- pure-JAX reference ------------------------------

def _ref_conv_bn(x_nhwc, w, gamma, beta, stride, padding, relu, eps=1e-5):
    y = jax.lax.conv_general_dilated(
        x_nhwc, w, window_strides=(stride, stride),
        padding=[(padding, padding), (padding, padding)],
        dimension_numbers=("NHWC", "HWIO", "NHWC"))
    mean = jnp.mean(y, axis=(0, 1, 2), keepdims=True)
    var = jnp.mean((y - mean) ** 2, axis=(0, 1, 2), keepdims=True)
    y = (y - mean) * jax.lax.rsqrt(var + eps) * gamma.reshape(1, 1, 1, -1) \
        + beta.reshape(1, 1, 1, -1)
    return jnp.maximum(y, 0.0) if relu else y


def resblock_reference(x_nchw, params, stride):
    x = jnp.transpose(x_nchw, (0, 2, 3, 1))
    y = _ref_conv_bn(x, params["w1"], params["g1"], params["b1"], stride, 1, True)
    y = _ref_conv_bn(y, params["w2"], params["g2"], params["b2"], 1, 1, False)
    if "ws" in params:
        s = _ref_conv_bn(x, params["ws"], params["gs"], params["bs"], stride, 0, False)
    else:
        s = x
    out = jnp.maximum(y + s, 0.0)
    return jnp.transpose(out, (0, 3, 1, 2))


# --------------------------------- main --------------------------------------

if __name__ == "__main__":
    key = jax.random.PRNGKey(0)
    kx, kp, kx2, kp2 = jax.random.split(key, 4)

    # Case 1: projection shortcut (stride=2, Cin != Cout).
    N, Cin, H, W = 2, 4, 16, 16
    Cout, stride = 8, 2
    x = jax.random.normal(kx, (N, Cin, H, W), jnp.float32)
    params = init_resblock_params(kp, Cin, Cout, stride)
    out = jax.block_until_ready(resblock_forward(x, params, stride))
    ref = resblock_reference(x, params, stride)
    assert out.shape == (N, Cout, H // stride, W // stride), out.shape
    assert bool(jnp.all(out >= 0.0))
    assert bool(jnp.all(jnp.isfinite(out)))
    err = float(jnp.max(jnp.abs(out - ref)))
    assert err < 0.25, f"projection-path max abs err vs reference: {err}"

    # Case 2: identity shortcut (stride=1, Cin == Cout).
    N2, C2, H2, W2 = 2, 8, 8, 8
    x2 = jax.random.normal(kx2, (N2, C2, H2, W2), jnp.float32)
    params2 = init_resblock_params(kp2, C2, C2, 1)
    out2 = jax.block_until_ready(resblock_forward(x2, params2, 1))
    ref2 = resblock_reference(x2, params2, 1)
    assert out2.shape == (N2, C2, H2, W2), out2.shape
    assert bool(jnp.all(out2 >= 0.0))
    assert bool(jnp.all(jnp.isfinite(out2)))
    err2 = float(jnp.max(jnp.abs(out2 - ref2)))
    assert err2 < 0.25, f"identity-path max abs err vs reference: {err2}"

    print("KERNEL_OK")
</pallas_src>

<mosaic_0001>
module attributes {stable_mosaic.version = 11 : i64} {
  func.func @_matmul_stats_kernel(%arg0: i32, %arg1: memref<128x128xbf16, #tpu.memory_space<vmem>>, %arg2: memref<128x128xbf16, #tpu.memory_space<vmem>>, %arg3: memref<128x128xbf16, #tpu.memory_space<vmem>>, %arg4: memref<1x2x128xf32, #tpu.memory_space<vmem>>) attributes {dimension_semantics = [#tpu.dimension_semantics<parallel>], iteration_bounds = array<i64: 1>, scalar_prefetch = 0 : i64, scratch_operands = 0 : i64, tpu.core_type = #tpu.core_type<tc>, window_params = [{transform_indices = @transform_0, window_bounds = array<i64: 128, 128>}, {pipeline_mode = #tpu.pipeline_mode<synchronous>, transform_indices = @transform_1, window_bounds = array<i64: 128, 128>}, {transform_indices = @transform_2, window_bounds = array<i64: 128, 128>}, {transform_indices = @transform_3, window_bounds = array<i64: 1, 2, 128>}]} {
    %c0 = arith.constant 0 : index
    %c0_0 = arith.constant 0 : index
    %0 = vector.load %arg1[%c0, %c0_0] : memref<128x128xbf16, #tpu.memory_space<vmem>>, vector<128x128xbf16>
    %c0_1 = arith.constant 0 : index
    %c0_2 = arith.constant 0 : index
    %1 = vector.load %arg2[%c0_1, %c0_2] : memref<128x128xbf16, #tpu.memory_space<vmem>>, vector<128x128xbf16>
    %cst = arith.constant dense<0.000000e+00> : vector<128x128xf32>
    %2 = tpu.matmul %0, %1, %cst {dimension_numbers = #tpu.dot_dimension_numbers<[1], [0], [0], [1], [0, 0, 1, 1], [], []>} : vector<128x128xbf16>, vector<128x128xbf16>, vector<128x128xf32> -> vector<128x128xf32>
    %3 = arith.truncf %2 : vector<128x128xf32> to vector<128x128xbf16>
    %c0_3 = arith.constant 0 : index
    %c0_4 = arith.constant 0 : index
    %4 = vector.load %arg3[%c0_3, %c0_4] : memref<128x128xbf16, #tpu.memory_space<vmem>>, vector<128x128xbf16>
    tpu.vector_store %arg3[%c0_3, %c0_4], %3 {strides = array<i32>} : memref<128x128xbf16, #tpu.memory_space<vmem>>, vector<128x128xbf16>,
    %cst_5 = arith.constant dense<0.000000e+00> : vector<128xf32>
    %5 = vector.multi_reduction <add>, %2, %cst_5 [0] : vector<128x128xf32> to vector<128xf32>
    %6 = vector.shape_cast %5 : vector<128xf32> to vector<1x128xf32>
    %c0_6 = arith.constant 0 : index
    %c0_7 = arith.constant 0 : index
    %c0_8 = arith.constant 0 : index
    %7 = vector.load %arg4[%c0_6, %c0_7, %c0_8] : memref<1x2x128xf32, #tpu.memory_space<vmem>>, vector<1x1x128xf32>
    %8 = vector.shape_cast %7 : vector<1x1x128xf32> to vector<1x128xf32>
    %9 = vector.shape_cast %6 : vector<1x128xf32> to vector<1x1x128xf32>
    tpu.vector_store %arg4[%c0_6, %c0_7, %c0_8], %9 {strides = array<i32>} : memref<1x2x128xf32, #tpu.memory_space<vmem>>, vector<1x1x128xf32>,
    %10 = arith.mulf %2, %2 : vector<128x128xf32>
    %cst_9 = arith.constant dense<0.000000e+00> : vector<128xf32>
    %11 = vector.multi_reduction <add>, %10, %cst_9 [0] : vector<128x128xf32> to vector<128xf32>
    %12 = vector.shape_cast %11 : vector<128xf32> to vector<1x128xf32>
    %c0_10 = arith.constant 0 : index
    %c1 = arith.constant 1 : index
    %c0_11 = arith.constant 0 : index
    %13 = vector.load %arg4[%c0_10, %c1, %c0_11] : memref<1x2x128xf32, #tpu.memory_space<vmem>>, vector<1x1x128xf32>
    %14 = vector.shape_cast %13 : vector<1x1x128xf32> to vector<1x128xf32>
    %15 = vector.shape_cast %12 : vector<1x128xf32> to vector<1x1x128xf32>
    tpu.vector_store %arg4[%c0_10, %c1, %c0_11], %15 {strides = array<i32>} : memref<1x2x128xf32, #tpu.memory_space<vmem>>, vector<1x1x128xf32>,
    return
  }
  func.func @transform_0(%arg0: i32) -> (i32, i32) {
    %c0_i32 = arith.constant 0 : i32
    %c0_i32_0 = arith.constant 0 : i32
    return %arg0, %c0_i32 : i32, i32
  }
  func.func @transform_1(%arg0: i32) -> (i32, i32) {
    %c0_i32 = arith.constant 0 : i32
    %c0_i32_0 = arith.constant 0 : i32
    %c0_i32_1 = arith.constant 0 : i32
    return %c0_i32, %c0_i32_0 : i32, i32
  }
  func.func @transform_2(%arg0: i32) -> (i32, i32) {
    %c0_i32 = arith.constant 0 : i32
    %c0_i32_0 = arith.constant 0 : i32
    return %arg0, %c0_i32 : i32, i32
  }
  func.func @transform_3(%arg0: i32) -> (i32, i32, i32) {
    %c0_i32 = arith.constant 0 : i32
    %c0_i32_0 = arith.constant 0 : i32
    %c0_i32_1 = arith.constant 0 : i32
    return %arg0, %c0_i32, %c0_i32_0 : i32, i32, i32
  }
}

</mosaic_0001>

<bundles_post_ra>
// kernel: tpu_custom_call.1
= control target key start
LH: loop header
LB: loop body
LE: loop exit
PB: predicated region body
PF: predicated region fallthrough
CT: control target
= control target key end

     0   :  { %9 = vsyncpa [#allocation3], 0  ;;  %s825_s0 = inlined_call_operand.hbm [shape: bf16[128,128], index: 0, kind: input, shape index: {}]   ;;  %s826_s1 = inlined_call_operand.hbm [shape: bf16[128,128], index: 1, kind: input, shape index: {}]   ;;  %s827_s2 = inlined_call_operand.hbm [shape: bf16[128,128], index: 2, kind: output, shape index: {0}]   ;;  %s828_s3 = inlined_call_operand.hbm [shape: f32[1,2,128], index: 3, kind: output, shape index: {1}]  }
   0x1   :  { %10 = vsyncpa [#allocation6], 0 }
   0x2   :  { %11 = vsyncpa [#allocation4], 0 }
   0x3   :  { %12 = vsyncpa [#allocation9], 0  ;;  %s718_s12 = smov [#allocation2]   ;;  %s622_s16 = scalar_lea.hbm %s825_s0, 1024 }
   0x4   :  { %s18_s13 = sshll.u32 %s718_s12, 4  ;;  %p623_p0 = scmp.ne.s32.totalorder %s825_s0, %s622_s16  ;;  %s19_s13 = int_to_ptr.vmem [resolvable:$true] %s18_s13 }
   0x5   :  { %p626_p1 = scmp.lt.u32.totalorder %s622_s16, %s825_s0 }
   0x7   :  { %p628_p2 = pnand %p626_p1, %p623_p0 }
   0x9   :  { %631 = shalt.err (!%p628_p2)
}
   0xa   :  { %s632_s21 = scalar_lea.vmem %s19_s13, 1024  ;;  %p637_p4 = scmp.lt.s32.totalorder %s19_s13, %s19_s13 }
   0xb   :  { %p633_p3 = scmp.ne.s32.totalorder %s19_s13, %s632_s21  ;;  %p638_p5 = scmp.lt.s32.totalorder %s632_s21, %s632_s21 }
   0xd   :  { %p639_p6 = por %p638_p5, %p637_p4 }
   0xf   :  { %p640_p7 = pnand %p639_p6, %p633_p3 }
  0x11   :  { %643 = shalt.err (!%p640_p7)
}
  0x12   :  { %s719_s22 = smov 64   ;;  %s720_s23 = smov 4  }
  0x13   :  { %24 = dma.hbm_to_vmem [thread:$0]  %s825_s0, 1024, %s19_s13, [#allocation3], %s719_s22, %s719_s22, %s720_s23  }
  0x14   :  { %s721_s26 = smov [#allocation5]   ;;  %s644_s30 = scalar_lea.hbm %s826_s1, 1024 }
  0x15   :  { %s30_s27 = sshll.u32 %s721_s26, 4  ;;  %p645_p8 = scmp.ne.s32.totalorder %s826_s1, %s644_s30  ;;  %s31_s27 = int_to_ptr.vmem [resolvable:$true] %s30_s27 }
  0x16   :  { %p648_p9 = scmp.lt.u32.totalorder %s644_s30, %s826_s1 }
  0x18   :  { %p650_p10 = pnand %p648_p9, %p645_p8 }
  0x1a   :  { %653 = shalt.err (!%p650_p10)
}
  0x1b   :  { %s654_s8 = scalar_lea.vmem %s31_s27, 1024  ;;  %p659_p12 = scmp.lt.s32.totalorder %s31_s27, %s31_s27 }
  0x1c   :  { %p655_p11 = scmp.ne.s32.totalorder %s31_s27, %s654_s8  ;;  %p660_p13 = scmp.lt.s32.totalorder %s654_s8, %s654_s8 }
  0x1e   :  { %p661_p0 = por %p660_p13, %p659_p12 }
  0x20   :  { %p662_p1 = pnand %p661_p0, %p655_p11 }
  0x22   :  { %665 = shalt.err (!%p662_p1)
}
  0x23   :  { %36 = dma.hbm_to_vmem [thread:$0]  %s826_s1, 1024, %s31_s27, [#allocation6], %s719_s22, %s719_s22, %s720_s23  }
  0x24   :  { %710 = dma.done.wait [#allocation3], 1024  }
  0x25   :  { %711 = vsyncadd [#allocation3], 4294966272 }
  0x26   :  { %712 = dma.done.wait [#allocation6], 1024  }
  0x27   :  { %713 = vsyncadd [#allocation6], 4294966272  ;;  %v606_v0 = vld [vmem:[#allocation5] sm:$0xff]   ;;  %v607_v1 = vld [vmem:[#allocation5 + $0x8] sm:$0xff]   ;;  %s722_s1 = smov [#allocation7]  }
  0x28   :  { %552 = vmatprep.subr.bf16.mxu0 %v606_v0  ;;  %584 = vmatprep.subr.bf16.mxu1 %v606_v0  ;;  %v608_v2 = vld [vmem:[#allocation5 + $0x10] sm:$0xff]   ;;  %v609_v3 = vld [vmem:[#allocation5 + $0x18] sm:$0xff]   ;;  %v614_v4 = vld [vmem:[#allocation2] sm:$0xff]   ;;  %s414_s10 = sshll.u32 %s722_s1, 4  ;;  %s415_s10 = int_to_ptr.vmem [resolvable:$true] %s414_s10 }
  0x29   :  { %553 = vmatpush3.bf16.msra.mxu0 %v606_v0  ;;  %592 = vmatpush3.bf16.msra.mxu1 %v606_v0  ;;  %v610_v5 = vld [vmem:[#allocation5 + $0x20] sm:$0xff]   ;;  %v611_v7 = vld [vmem:[#allocation5 + $0x28] sm:$0xff]   ;;  %v612_v8 = vld [vmem:[#allocation5 + $0x30] sm:$0xff]   ;;  %s666_s11 = scalar_lea.vmem %s415_s10, 1024  ;;  %p671_p3 = scmp.lt.s32.totalorder %s415_s10, %s415_s10 }
  0x2a   :  { %554 = vmatprep.subr.bf16.mxu0 %v607_v1  ;;  %585 = vmatprep.subr.bf16.mxu1 %v607_v1  ;;  %v618_v6 = vld [vmem:[#allocation2 + $0x20] sm:$0xff]   ;;  %v613_v9 = vld [vmem:[#allocation5 + $0x38] sm:$0xff]   ;;  %v615_v10 = vld [vmem:[#allocation2 + $0x8] sm:$0xff]   ;;  %p667_p2 = scmp.ne.s32.totalorder %s415_s10, %s666_s11  ;;  %p672_p4 = scmp.lt.s32.totalorder %s666_s11, %s666_s11 }
  0x2b   :  { %568 = vmatprep.mubr.bf16.mxu0 %v614_v4  ;;  %576 = vmatprep.mubr.bf16.mxu1 %v618_v6  ;;  %v619_v11 = vld [vmem:[#allocation2 + $0x28] sm:$0xff]   ;;  %v616_v12 = vld [vmem:[#allocation2 + $0x10] sm:$0xff]   ;;  %v617_v14 = vld [vmem:[#allocation2 + $0x18] sm:$0xff]  }
  0x2c   :  { %v620_v13 = vld [vmem:[#allocation2 + $0x30] sm:$0xff]   ;;  %v621_v15 = vld [vmem:[#allocation2 + $0x38] sm:$0xff]   ;;  %p673_p5 = por %p672_p4, %p671_p3 }
  0x2d   :  { %555 = vmatpush3.bf16.msra.mxu0 %v607_v1  ;;  %593 = vmatpush3.bf16.msra.mxu1 %v607_v1 }
  0x2e   :  { %556 = vmatprep.subr.bf16.mxu0 %v608_v2  ;;  %586 = vmatprep.subr.bf16.mxu1 %v608_v2  ;;  %p674_p6 = pnand %p673_p5, %p667_p2 }
  0x31   :  { %557 = vmatpush3.bf16.msra.mxu0 %v608_v2  ;;  %594 = vmatpush3.bf16.msra.mxu1 %v608_v2 }
  0x32   :  { %558 = vmatprep.subr.bf16.mxu0 %v609_v3  ;;  %587 = vmatprep.subr.bf16.mxu1 %v609_v3 }
  0x35   :  { %559 = vmatpush3.bf16.msra.mxu0 %v609_v3  ;;  %595 = vmatpush3.bf16.msra.mxu1 %v609_v3 }
  0x36   :  { %560 = vmatprep.subr.bf16.mxu0 %v610_v5  ;;  %588 = vmatprep.subr.bf16.mxu1 %v610_v5 }
  0x39   :  { %561 = vmatpush3.bf16.msra.mxu0 %v610_v5  ;;  %596 = vmatpush3.bf16.msra.mxu1 %v610_v5 }
  0x3a   :  { %562 = vmatprep.subr.bf16.mxu0 %v611_v7  ;;  %589 = vmatprep.subr.bf16.mxu1 %v611_v7 }
  0x3d   :  { %563 = vmatpush3.bf16.msra.mxu0 %v611_v7  ;;  %597 = vmatpush3.bf16.msra.mxu1 %v611_v7 }
  0x3e   :  { %564 = vmatprep.subr.bf16.mxu0 %v612_v8  ;;  %590 = vmatprep.subr.bf16.mxu1 %v612_v8 }
  0x41   :  { %565 = vmatpush3.bf16.msra.mxu0 %v612_v8  ;;  %598 = vmatpush3.bf16.msra.mxu1 %v612_v8 }
  0x42   :  { %566 = vmatprep.subr.bf16.mxu0 %v613_v9  ;;  %591 = vmatprep.subr.bf16.mxu1 %v613_v9 }
  0x45   :  { %567 = vmatpush3.bf16.msra.mxu0 %v613_v9  ;;  %599 = vmatpush3.bf16.msra.mxu1 %v613_v9 }
  0x48   :  { %569 = vmatmul.mubr.bf16.vlgmr.msra.gmra.mrb[0].mxu0 %v615_v10  ;;  %577 = vmatmul.mubr.bf16.vlgmr.msra.gmra.mrb[0].mxu1 %v619_v11 }
  0x49   :  { %572 = vmatprep.mubr.bf16.mxu0 %v616_v12  ;;  %580 = vmatprep.mubr.bf16.mxu1 %v620_v13 }
  0x50   :  { %573 = vmatmul.mubr.bf16.gmra.mrb[4].mxu0 %v617_v14  ;;  %581 = vmatmul.mubr.bf16.gmra.mrb[4].mxu1 %v621_v15 }
 0x11b   :  { %v570_v16 = vpop.f32.mrb[0].mxu0  ;;  %v774_v17 = vpop.f32.mrb[0].mxu1 }
 0x11c   :  { %v206_v18 = vpop.f32.mrb[1].mxu0  ;;  %v776_v19 = vpop.f32.mrb[1].mxu1  ;;  %v373_v31 = vmul.f32 %v570_v16, %v570_v16 }
 0x11d   :  { %v571_v20 = vpop.f32.mrb[2].mxu0  ;;  %v778_v21 = vpop.f32.mrb[2].mxu1  ;;  %v371_v22 = vmul.f32 %v206_v18, %v206_v18  ;;  %v379_v61 = vmul.f32 %v776_v19, %v776_v19 }
 0x11e   :  { %v497_v23 = vpack.c.bf16 %v571_v20, %v570_v16  ;;  %v209_v24 = vpop.f32.mrb[3].mxu0  ;;  %v517_v25 = vpack.c.bf16 %v778_v21, %v774_v17  ;;  %v782_v26 = vpop.f32.mrb[3].mxu1  ;;  %v374_v34 = vmul.f32 %v571_v20, %v571_v20 }
 0x11f   :  { %v492_v27 = vpack.c.bf16 %v209_v24, %v206_v18  ;;  %v349_v28 = vadd.f32 %v209_v24, %v206_v18  ;;  %v372_v29 = vmul.f32 %v209_v24, %v209_v24  ;;  %v512_v30 = vpack.c.bf16 %v782_v26, %v776_v19 }
 0x120   :  { %529 = vst [vmem:[#allocation7 + $0x8] sm:$0xff] %v497_v23   ;;  %533 = vst [vmem:[#allocation7 + $0x28] sm:$0xff] %v517_v25  }
 0x121   :  { %493 = vst [vmem:[#allocation7] sm:$0xff] %v492_v27   ;;  %v350_v32 = vadd.f32 %v570_v16, %v349_v28  ;;  %v387_v33 = vadd.f32 %v372_v29, %v371_v22  ;;  %532 = vst [vmem:[#allocation7 + $0x20] sm:$0xff] %v512_v30  }
 0x123   :  { %v388_v35 = vadd.f32 %v387_v33, %v373_v31  ;;  %v574_v36 = vpop.f32.mrb[4].mxu0  ;;  %v351_v37 = vadd.f32 %v571_v20, %v350_v32  ;;  %v582_v38 = vpop.f32.mrb[4].mxu1 }
 0x124   :  { %v222_v39 = vpop.f32.mrb[5].mxu0  ;;  %v254_v40 = vpop.f32.mrb[5].mxu1  ;;  %v377_v55 = vmul.f32 %v574_v36, %v574_v36 }
 0x125   :  { %v352_v41 = vadd.f32 %v351_v37, %v222_v39  ;;  %v375_v42 = vmul.f32 %v222_v39, %v222_v39  ;;  %v389_v43 = vadd.f32 %v388_v35, %v374_v34  ;;  %v575_v44 = vpop.f32.mrb[6].mxu0  ;;  %v583_v45 = vpop.f32.mrb[6].mxu1 }
 0x126   :  { %v507_v46 = vpack.c.bf16 %v575_v44, %v574_v36  ;;  %v225_v47 = vpop.f32.mrb[7].mxu0  ;;  %v527_v48 = vpack.c.bf16 %v583_v45, %v582_v38  ;;  %v257_v49 = vpop.f32.mrb[7].mxu1  ;;  %v378_v58 = vmul.f32 %v575_v44, %v575_v44 }
 0x127   :  { %v390_v50 = vadd.f32 %v389_v43, %v375_v42  ;;  %v502_v51 = vpack.c.bf16 %v225_v47, %v222_v39  ;;  %v353_v52 = vadd.f32 %v352_v41, %v225_v47  ;;  %v376_v53 = vmul.f32 %v225_v47, %v225_v47 }
 0x128   :  { %531 = vst [vmem:[#allocation7 + $0x18] sm:$0xff] %v507_v46   ;;  %535 = vst [vmem:[#allocation7 + $0x38] sm:$0xff] %v527_v48   ;;  %v522_v54 = vpack.c.bf16 %v257_v49, %v254_v40 }
 0x129   :  { %530 = vst [vmem:[#allocation7 + $0x10] sm:$0xff] %v502_v51   ;;  %v354_v56 = vadd.f32 %v574_v36, %v353_v52  ;;  %v391_v57 = vadd.f32 %v390_v50, %v376_v53 }
 0x12a   :  { %534 = vst [vmem:[#allocation7 + $0x30] sm:$0xff] %v522_v54  }
 0x12b   :  { %v392_v59 = vadd.f32 %v391_v57, %v377_v55  ;;  %v355_v60 = vadd.f32 %v575_v44, %v354_v56 }
 0x12c   :  { %677 = shalt.err (!%p674_p6)
}
 0x12d   :  { %s678_s14 = scalar_lea.hbm %s827_s2, 1024 }
 0x12e   :  { %p679_p7 = scmp.ne.s32.totalorder %s827_s2, %s678_s14  ;;  %p682_p8 = scmp.lt.u32.totalorder %s678_s14, %s827_s2 }
 0x130   :  { %p684_p9 = pnand %p682_p8, %p679_p7 }
 0x132   :  { %687 = shalt.err (!%p684_p9)
}
 0x133   :  { %420 = dma.vmem_to_hbm [thread:$0]  %s415_s10, 1024, %s827_s2, [#allocation4], %s719_s22, %s719_s22, %s720_s23   ;;  %v356_v62 = vadd.f32 %v355_v60, %v776_v19  ;;  %v393_v63 = vadd.f32 %v392_v59, %v378_v58  ;;  %v380_v2 = vmul.f32 %v782_v26, %v782_v26  ;;  %v381_v3 = vmul.f32 %v774_v17, %v774_v17 }
 0x134   :  { %v382_v6 = vmul.f32 %v778_v21, %v778_v21  ;;  %v383_v9 = vmul.f32 %v254_v40, %v254_v40  ;;  %v384_v14 = vmul.f32 %v257_v49, %v257_v49  ;;  %v385_v15 = vmul.f32 %v582_v38, %v582_v38  ;;  %s723_s2 = smov [#allocation8]  }
 0x135   :  { %v394_v0 = vadd.f32 %v393_v63, %v379_v61  ;;  %v357_v1 = vadd.f32 %v356_v62, %v782_v26  ;;  %v386_v19 = vmul.f32 %v583_v45, %v583_v45  ;;  %s427_s21 = sshll.u32 %s723_s2, 4  ;;  %s428_s21 = int_to_ptr.vmem [resolvable:$true] %s427_s21 }
 0x136   :  { %s688_s22 = scalar_lea.vmem %s428_s21, 32  ;;  %p693_p11 = scmp.lt.s32.totalorder %s428_s21, %s428_s21 }
 0x137   :  { %v358_v4 = vadd.f32 %v774_v17, %v357_v1  ;;  %v395_v5 = vadd.f32 %v394_v0, %v380_v2  ;;  %p689_p10 = scmp.ne.s32.totalorder %s428_s21, %s688_s22  ;;  %p694_p12 = scmp.lt.s32.totalorder %s688_s22, %s688_s22 }
 0x139   :  { %v396_v7 = vadd.f32 %v395_v5, %v381_v3  ;;  %v359_v8 = vadd.f32 %v778_v21, %v358_v4  ;;  %p695_p13 = por %p694_p12, %p693_p11 }
 0x13b   :  { %v360_v10 = vadd.f32 %v359_v8, %v254_v40  ;;  %v397_v11 = vadd.f32 %v396_v7, %v382_v6  ;;  %p696_p0 = pnand %p695_p13, %p689_p10 }
 0x13d   :  { %v398_v12 = vadd.f32 %v397_v11, %v383_v9  ;;  %v361_v13 = vadd.f32 %v360_v10, %v257_v49 }
 0x13f   :  { %v362_v16 = vadd.f32 %v582_v38, %v361_v13  ;;  %v399_v18 = vadd.f32 %v398_v12, %v384_v14 }
 0x141   :  { %v363_v20 = vadd.f32 %v583_v45, %v362_v16  ;;  %v400_v22 = vadd.f32 %v399_v18, %v385_v15 }
 0x143   :  { %v364_v17 = vrot.slane %v363_v20, 4  ;;  %v401_v23 = vadd.f32 %v400_v22, %v386_v19 }
 0x145   :  { %v365_v24 = vadd.f32 %v364_v17, %v363_v20  ;;  %v402_v25 = vrot.slane %v401_v23, 4 }
 0x147   :  { %v366_v26 = vrot.slane %v365_v24, 2  ;;  %v403_v27 = vadd.f32 %v402_v25, %v401_v23 }
 0x149   :  { %v367_v28 = vadd.f32 %v366_v26, %v365_v24  ;;  %v404_v21 = vrot.slane %v403_v27, 2 }
 0x14b   :  { %v368_v29 = vrot.slane %v367_v28, 1  ;;  %v405_v30 = vadd.f32 %v404_v21, %v403_v27 }
 0x14d   :  { %v369_v31 = vadd.f32 %v368_v29, %v367_v28  ;;  %v406_v32 = vrot.slane %v405_v30, 1 }
 0x14f   :  { %370 = vst [vmem:[#allocation8] sm:$0x1] %v369_v31  ;;  %v407_v33 = vadd.f32 %v406_v32, %v405_v30 }
 0x151   :  { %408 = vst [vmem:[#allocation8 + $0x1] sm:$0x1] %v407_v33 }
 0x152   :  { %699 = shalt.err (!%p696_p0)
}
 0x153   :  { %s700_s25 = scalar_lea.hbm %s828_s3, 32 }
 0x154   :  { %p701_p1 = scmp.ne.s32.totalorder %s828_s3, %s700_s25  ;;  %p704_p2 = scmp.lt.u32.totalorder %s700_s25, %s828_s3 }
 0x156   :  { %p706_p3 = pnand %p704_p2, %p701_p1 }
 0x158   :  { %709 = shalt.err (!%p706_p3)
}
 0x159   :  { %430 = dma.vmem_to_hbm [thread:$0]  %s428_s21, 32, %s828_s3, [#allocation9]  }
 0x15a   :  { %714 = dma.done.wait [#allocation4], 1024  }
 0x15b   :  { %715 = vsyncadd [#allocation4], 4294966272 }
 0x15c   :  { %716 = dma.done.wait [#allocation9], 32  }
 0x15d   :  { %717 = vsyncadd [#allocation9], 4294967264 }
 0x15e   :  { %437 = vsyncpa [#allocation3], 1 }
 0x15f   :  { %438 = vsyncpa [#allocation6], 1 }
 0x160   :  { %439 = vsyncpa [#allocation4], 1 }
 0x161   :  { %440 = vsyncpa [#allocation9], 1 }

</bundles_post_ra>
